<compile_context>
chip_gen: v7x
topology: tpu7x:2x2x1
jax: 0.10.0
libtpu: 0.0.40
codegen_flags: <defaults>
</compile_context>

<pallas_src>
import jax
import jax.numpy as jnp
from jax.experimental import pallas as pl
from jax.experimental.pallas import tpu as pltpu


def _round_up(n, m):
    return -(-n // m) * m


def _n_net_kernel(x_ref, wf_ref, bf_ref, w2_ref, b2_ref, w3_ref, b3_ref,
                  w4_ref, b4_ref, w5_ref, b5_ref, out_ref):
    f32 = jnp.float32
    bf16 = jnp.bfloat16
    # MXU gets bf16 operands, accumulates in f32; bias-add / ReLU stay in f32.
    h = jnp.dot(x_ref[...].astype(bf16), wf_ref[...],
                preferred_element_type=f32) + bf_ref[...]
    h = jnp.maximum(h, 0.0)
    h = jnp.dot(h.astype(bf16), w2_ref[...],
                preferred_element_type=f32) + b2_ref[...]
    h = jnp.maximum(h, 0.0)
    h = jnp.dot(h.astype(bf16), w3_ref[...],
                preferred_element_type=f32) + b3_ref[...]
    h = jnp.maximum(h, 0.0)
    h = jnp.dot(h.astype(bf16), w4_ref[...],
                preferred_element_type=f32) + b4_ref[...]
    h = jnp.maximum(h, 0.0)
    out_ref[...] = jnp.dot(h.astype(bf16), w5_ref[...],
                           preferred_element_type=f32) + b5_ref[...]


def init_params(key, size_out):
    """Deterministic parameter init (same shapes as the PyTorch module).

    Weights stored as (in, out); biases stored as (1, out).
    embedding_weather (1 -> 8) is unused in forward() and therefore omitted.
    """
    dims = {
        "embedding_main": (64, 64),
        "embedding_extra": (128, 16),
        "dense_1": (80, 256),
        "dense_2": (256, 128),
        "dense_3": (128, 128),
        "dense_4": (128, 20),
        "dense_5": (20, size_out),
    }
    params = {}
    keys = jax.random.split(key, len(dims))
    for k, (name, (din, dout)) in zip(keys, dims.items()):
        kw, kb = jax.random.split(k)
        bound = 1.0 / (din ** 0.5)   # nn.Linear default U(-1/sqrt(in), 1/sqrt(in))
        w = jax.random.uniform(kw, (din, dout), jnp.float32, -bound, bound)
        b = jax.random.uniform(kb, (1, dout), jnp.float32, -bound, bound)
        params[name] = (w, b)
    return params


def _prepare_weights(params, size_in, size_out):
    """One-time folding + lane padding + bf16 cast of the MXU operands.

    Folding is done in f32; only the final weight matrices are cast to bf16
    (biases stay f32 for the f32 bias-add in the kernel).
    """
    w_em, b_em = params["embedding_main"]      # (64, 64), (1, 64)
    w_ee, b_ee = params["embedding_extra"]     # (128, 16), (1, 16)
    w1, b1 = params["dense_1"]                 # (80, 256), (1, 256)
    w2, b2 = params["dense_2"]                 # (256, 128), (1, 128)
    w3, b3 = params["dense_3"]                 # (128, 128), (1, 128)
    w4, b4 = params["dense_4"]                 # (128, 20),  (1, 20)
    w5, b5 = params["dense_5"]                 # (20, size_out)

    # --- fold embeddings into dense_1 (no nonlinearity between them) ---
    w1_main, w1_extra = w1[:64, :], w1[64:, :]
    w_main_fold = w_em @ w1_main                         # (64, 256)
    w_extra_fold = w_ee @ w1_extra                       # (128, 256)
    b_fold = b_em @ w1_main + b_ee @ w1_extra + b1       # (1, 256)

    # --- scatter folded rows into a (size_in, 256) weight so the kernel can
    #     consume x directly (absorbs view(B,4,8,L)[...,:2] / [...,2:6]).
    #     Scatter indices (ab*L + c <-> ab*2+c / ab*4+(c-2)) must stay exact.
    assert size_in % 32 == 0, "size_in must reshape to (4, 8, L)"
    L = size_in // 32
    assert L >= 6, "forward() slices [..., 2:6]; need L >= 6"
    ab = jnp.arange(32)                                  # combined (4x8) index
    w_full = jnp.zeros((size_in, 256), jnp.float32)
    for c in range(2):                                   # main-part columns
        w_full = w_full.at[ab * L + c].set(w_main_fold[ab * 2 + c])
    for c in range(2, 6):                                # extra-part columns
        w_full = w_full.at[ab * L + c].set(w_extra_fold[ab * 4 + (c - 2)])

    # --- zero-pad the narrow tails (20-wide hop, size_out output) to 128 lanes.
    #     Padded biases must stay exactly zero so ReLU keeps dead lanes zero.
    out_pad = _round_up(max(size_out, 1), 128)
    w4p = jnp.zeros((128, 128), jnp.float32).at[:, :20].set(w4)
    b4p = jnp.zeros((1, 128), jnp.float32).at[:, :20].set(b4)
    w5p = jnp.zeros((128, out_pad), jnp.float32).at[:20, :size_out].set(w5)
    b5p = jnp.zeros((1, out_pad), jnp.float32).at[:, :size_out].set(b5)

    bf16 = jnp.bfloat16
    weights = (w_full.astype(bf16), b_fold,
               w2.astype(bf16), b2,
               w3.astype(bf16), b3,
               w4p.astype(bf16), b4p,
               w5p.astype(bf16), b5p)
    return weights, out_pad


def _pick_batch_tile(batch, block_batch):
    """Pick the batch tile.

    Goals (perf review): large tiles (amortize per-step overhead, feed the
    MXU), a tile that divides the batch so the wrapper never pads x, and
    >= 2 grid steps for large batches so v7x's two TensorCores both get work.
    """
    block_batch = max(8, (block_batch // 8) * 8)
    if batch <= block_batch:
        # Big-but-single-tile batches: split in two so v7x megacore has work.
        if batch >= 1024 and batch % 16 == 0:
            return batch // 2
        return batch                      # one full-dim block, no padding
    # batch > block_batch: largest multiple-of-8 divisor of batch that is
    # <= block_batch (avoids the jnp.pad HBM copy); keep it reasonably large,
    # otherwise fall back to padding once.
    floor = max(8, ((block_batch // 4) // 8) * 8)
    for tb in range(block_batch, floor - 1, -8):
        if batch % tb == 0:
            return tb
    return block_batch


def n_net_forward(x, params, size_out, *, block_batch=1024, unpad=True):
    batch, size_in = x.shape
    weights, out_pad = _prepare_weights(params, size_in, size_out)

    tb = _pick_batch_tile(batch, block_batch)
    padded_batch = _round_up(batch, tb)
    if padded_batch != batch:
        # Only reached when no suitable divisor tile exists (rare fallback).
        x = jnp.pad(x, ((0, padded_batch - batch), (0, 0)))
    grid = (padded_batch // tb,)

    def const_spec(arr):
        # Block index never changes -> weights DMA'd once, resident in VMEM.
        return pl.BlockSpec(arr.shape, lambda i: (0, 0))

    in_specs = [pl.BlockSpec((tb, size_in), lambda i: (i, 0))]
    in_specs += [const_spec(w) for w in weights]
    out_spec = pl.BlockSpec((tb, out_pad), lambda i: (i, 0))

    flops_per_row = 2 * (size_in * 256 + 256 * 128 + 3 * 128 * 128)
    weight_bytes = sum(int(w.size) * w.dtype.itemsize for w in weights)
    cost = pl.CostEstimate(
        flops=flops_per_row * padded_batch,
        transcendentals=0,
        bytes_accessed=(padded_batch * size_in * x.dtype.itemsize
                        + padded_batch * out_pad * 4
                        + weight_bytes),
    )

    out = pl.pallas_call(
        _n_net_kernel,
        out_shape=jax.ShapeDtypeStruct((padded_batch, out_pad), jnp.float32),
        grid=grid,
        in_specs=in_specs,
        out_specs=out_spec,
        compiler_params=pltpu.CompilerParams(
            dimension_semantics=("parallel",),
            # v5e's default scoped VMEM (16 MiB) is too tight for tb >= ~2048;
            # 48 MiB is safe on v5e/v6e (128 MiB) and v7x (64 MiB) alike.
            vmem_limit_bytes=48 * 1024 * 1024,
        ),
        cost_estimate=cost,
    )(x, *weights)

    if unpad:
        # Downstream consumers that tolerate the padded, lane-dense (x128)
        # output should pass unpad=False to skip this extra HBM pass.
        out = out[:batch, :size_out]
    u = jnp.array([0.5], dtype=jnp.float32)
    return out, u


def n_net_reference(x, params):
    """Pure-JAX f32 reference of the PyTorch forward (unfused)."""
    batch = x.shape[0]
    resize_part = x.reshape(batch, 4, 8, -1)
    main_part = resize_part[..., :2].reshape(batch, -1)
    extra_part = resize_part[..., 2:6].reshape(batch, -1)
    w_em, b_em = params["embedding_main"]
    w_ee, b_ee = params["embedding_extra"]
    main_embed = main_part @ w_em + b_em
    extra_embed = extra_part @ w_ee + b_ee
    h = jnp.concatenate([main_embed, extra_embed], axis=1)
    for name in ("dense_1", "dense_2", "dense_3", "dense_4"):
        w, b = params[name]
        h = jnp.maximum(h @ w + b, 0.0)
    w, b = params["dense_5"]
    return h @ w + b


if __name__ == "__main__":
    size_out = 10
    batch = 8
    # x must reshape to (batch, 4, 8, L) with L >= 6; pick L = 6 -> size_in = 192
    size_in = 4 * 8 * 6

    key = jax.random.PRNGKey(0)
    kx, kp = jax.random.split(key)
    x = jax.random.normal(kx, (batch, size_in), dtype=jnp.float32)
    params = init_params(kp, size_out)

    out, u = n_net_forward(x, params, size_out)
    out = jax.block_until_ready(out)
    u = jax.block_until_ready(u)

    ref = n_net_reference(x, params)
    assert out.shape == (batch, size_out)
    assert u.shape == (1,) and float(u[0]) == 0.5
    # Tolerance covers (a) the f32 reassociation of the embedding fold and
    # (b) bf16 MXU operands (f32 accumulation) vs. the pure-f32 reference.
    assert jnp.allclose(out, ref, atol=3e-2, rtol=3e-2), "mismatch vs reference"

    print("KERNEL_OK")
</pallas_src>

<mosaic_0001>
module attributes {stable_mosaic.version = 11 : i64} {
  func.func @_n_net_kernel(%arg0: i32, %arg1: memref<8x192xf32, #tpu.memory_space<vmem>>, %arg2: memref<192x256xbf16, #tpu.memory_space<vmem>>, %arg3: memref<1x256xf32, #tpu.memory_space<vmem>>, %arg4: memref<256x128xbf16, #tpu.memory_space<vmem>>, %arg5: memref<1x128xf32, #tpu.memory_space<vmem>>, %arg6: memref<128x128xbf16, #tpu.memory_space<vmem>>, %arg7: memref<1x128xf32, #tpu.memory_space<vmem>>, %arg8: memref<128x128xbf16, #tpu.memory_space<vmem>>, %arg9: memref<1x128xf32, #tpu.memory_space<vmem>>, %arg10: memref<128x128xbf16, #tpu.memory_space<vmem>>, %arg11: memref<1x128xf32, #tpu.memory_space<vmem>>, %arg12: memref<8x128xf32, #tpu.memory_space<vmem>>) attributes {dimension_semantics = [#tpu.dimension_semantics<parallel>], iteration_bounds = array<i64: 1>, scalar_prefetch = 0 : i64, scratch_operands = 0 : i64, tpu.core_type = #tpu.core_type<tc>, window_params = [{transform_indices = @transform_0, window_bounds = array<i64: 8, 192>}, {pipeline_mode = #tpu.pipeline_mode<synchronous>, transform_indices = @transform_1, window_bounds = array<i64: 192, 256>}, {pipeline_mode = #tpu.pipeline_mode<synchronous>, transform_indices = @transform_2, window_bounds = array<i64: 1, 256>}, {pipeline_mode = #tpu.pipeline_mode<synchronous>, transform_indices = @transform_3, window_bounds = array<i64: 256, 128>}, {pipeline_mode = #tpu.pipeline_mode<synchronous>, transform_indices = @transform_4, window_bounds = array<i64: 1, 128>}, {pipeline_mode = #tpu.pipeline_mode<synchronous>, transform_indices = @transform_5, window_bounds = array<i64: 128, 128>}, {pipeline_mode = #tpu.pipeline_mode<synchronous>, transform_indices = @transform_6, window_bounds = array<i64: 1, 128>}, {pipeline_mode = #tpu.pipeline_mode<synchronous>, transform_indices = @transform_7, window_bounds = array<i64: 128, 128>}, {pipeline_mode = #tpu.pipeline_mode<synchronous>, transform_indices = @transform_8, window_bounds = array<i64: 1, 128>}, {pipeline_mode = #tpu.pipeline_mode<synchronous>, transform_indices = @transform_9, window_bounds = array<i64: 128, 128>}, {pipeline_mode = #tpu.pipeline_mode<synchronous>, transform_indices = @transform_10, window_bounds = array<i64: 1, 128>}, {transform_indices = @transform_11, window_bounds = array<i64: 8, 128>}]} {
    %c0 = arith.constant 0 : index
    %c0_0 = arith.constant 0 : index
    %0 = vector.load %arg1[%c0, %c0_0] : memref<8x192xf32, #tpu.memory_space<vmem>>, vector<8x192xf32>
    %1 = arith.truncf %0 : vector<8x192xf32> to vector<8x192xbf16>
    %c0_1 = arith.constant 0 : index
    %c0_2 = arith.constant 0 : index
    %2 = vector.load %arg2[%c0_1, %c0_2] : memref<192x256xbf16, #tpu.memory_space<vmem>>, vector<192x256xbf16>
    %cst = arith.constant dense<0.000000e+00> : vector<8x256xf32>
    %3 = tpu.matmul %1, %2, %cst {dimension_numbers = #tpu.dot_dimension_numbers<[1], [0], [0], [1], [0, 0, 1, 1], [], []>} : vector<8x192xbf16>, vector<192x256xbf16>, vector<8x256xf32> -> vector<8x256xf32>
    %c0_3 = arith.constant 0 : index
    %c0_4 = arith.constant 0 : index
    %4 = vector.load %arg3[%c0_3, %c0_4] : memref<1x256xf32, #tpu.memory_space<vmem>>, vector<1x256xf32>
    %5 = vector.broadcast %4 : vector<1x256xf32> to vector<8x256xf32>
    %6 = arith.addf %3, %5 : vector<8x256xf32>
    %cst_5 = arith.constant 0.000000e+00 : f32
    %7 = vector.broadcast %cst_5 : f32 to vector<8x256xf32>
    %8 = arith.maximumf %6, %7 : vector<8x256xf32>
    %9 = arith.truncf %8 : vector<8x256xf32> to vector<8x256xbf16>
    %c0_6 = arith.constant 0 : index
    %c0_7 = arith.constant 0 : index
    %10 = vector.load %arg4[%c0_6, %c0_7] : memref<256x128xbf16, #tpu.memory_space<vmem>>, vector<256x128xbf16>
    %cst_8 = arith.constant dense<0.000000e+00> : vector<8x128xf32>
    %11 = tpu.matmul %9, %10, %cst_8 {dimension_numbers = #tpu.dot_dimension_numbers<[1], [0], [0], [1], [0, 0, 1, 1], [], []>} : vector<8x256xbf16>, vector<256x128xbf16>, vector<8x128xf32> -> vector<8x128xf32>
    %c0_9 = arith.constant 0 : index
    %c0_10 = arith.constant 0 : index
    %12 = vector.load %arg5[%c0_9, %c0_10] : memref<1x128xf32, #tpu.memory_space<vmem>>, vector<1x128xf32>
    %13 = vector.broadcast %12 : vector<1x128xf32> to vector<8x128xf32>
    %14 = arith.addf %11, %13 : vector<8x128xf32>
    %cst_11 = arith.constant 0.000000e+00 : f32
    %15 = vector.broadcast %cst_11 : f32 to vector<8x128xf32>
    %16 = arith.maximumf %14, %15 : vector<8x128xf32>
    %17 = arith.truncf %16 : vector<8x128xf32> to vector<8x128xbf16>
    %c0_12 = arith.constant 0 : index
    %c0_13 = arith.constant 0 : index
    %18 = vector.load %arg6[%c0_12, %c0_13] : memref<128x128xbf16, #tpu.memory_space<vmem>>, vector<128x128xbf16>
    %cst_14 = arith.constant dense<0.000000e+00> : vector<8x128xf32>
    %19 = tpu.matmul %17, %18, %cst_14 {dimension_numbers = #tpu.dot_dimension_numbers<[1], [0], [0], [1], [0, 0, 1, 1], [], []>} : vector<8x128xbf16>, vector<128x128xbf16>, vector<8x128xf32> -> vector<8x128xf32>
    %c0_15 = arith.constant 0 : index
    %c0_16 = arith.constant 0 : index
    %20 = vector.load %arg7[%c0_15, %c0_16] : memref<1x128xf32, #tpu.memory_space<vmem>>, vector<1x128xf32>
    %21 = vector.broadcast %20 : vector<1x128xf32> to vector<8x128xf32>
    %22 = arith.addf %19, %21 : vector<8x128xf32>
    %cst_17 = arith.constant 0.000000e+00 : f32
    %23 = vector.broadcast %cst_17 : f32 to vector<8x128xf32>
    %24 = arith.maximumf %22, %23 : vector<8x128xf32>
    %25 = arith.truncf %24 : vector<8x128xf32> to vector<8x128xbf16>
    %c0_18 = arith.constant 0 : index
    %c0_19 = arith.constant 0 : index
    %26 = vector.load %arg8[%c0_18, %c0_19] : memref<128x128xbf16, #tpu.memory_space<vmem>>, vector<128x128xbf16>
    %cst_20 = arith.constant dense<0.000000e+00> : vector<8x128xf32>
    %27 = tpu.matmul %25, %26, %cst_20 {dimension_numbers = #tpu.dot_dimension_numbers<[1], [0], [0], [1], [0, 0, 1, 1], [], []>} : vector<8x128xbf16>, vector<128x128xbf16>, vector<8x128xf32> -> vector<8x128xf32>
    %c0_21 = arith.constant 0 : index
    %c0_22 = arith.constant 0 : index
    %28 = vector.load %arg9[%c0_21, %c0_22] : memref<1x128xf32, #tpu.memory_space<vmem>>, vector<1x128xf32>
    %29 = vector.broadcast %28 : vector<1x128xf32> to vector<8x128xf32>
    %30 = arith.addf %27, %29 : vector<8x128xf32>
    %cst_23 = arith.constant 0.000000e+00 : f32
    %31 = vector.broadcast %cst_23 : f32 to vector<8x128xf32>
    %32 = arith.maximumf %30, %31 : vector<8x128xf32>
    %33 = arith.truncf %32 : vector<8x128xf32> to vector<8x128xbf16>
    %c0_24 = arith.constant 0 : index
    %c0_25 = arith.constant 0 : index
    %34 = vector.load %arg10[%c0_24, %c0_25] : memref<128x128xbf16, #tpu.memory_space<vmem>>, vector<128x128xbf16>
    %cst_26 = arith.constant dense<0.000000e+00> : vector<8x128xf32>
    %35 = tpu.matmul %33, %34, %cst_26 {dimension_numbers = #tpu.dot_dimension_numbers<[1], [0], [0], [1], [0, 0, 1, 1], [], []>} : vector<8x128xbf16>, vector<128x128xbf16>, vector<8x128xf32> -> vector<8x128xf32>
    %c0_27 = arith.constant 0 : index
    %c0_28 = arith.constant 0 : index
    %36 = vector.load %arg11[%c0_27, %c0_28] : memref<1x128xf32, #tpu.memory_space<vmem>>, vector<1x128xf32>
    %37 = vector.broadcast %36 : vector<1x128xf32> to vector<8x128xf32>
    %38 = arith.addf %35, %37 : vector<8x128xf32>
    %c0_29 = arith.constant 0 : index
    %c0_30 = arith.constant 0 : index
    %39 = vector.load %arg12[%c0_29, %c0_30] : memref<8x128xf32, #tpu.memory_space<vmem>>, vector<8x128xf32>
    tpu.vector_store %arg12[%c0_29, %c0_30], %38 {strides = array<i32>} : memref<8x128xf32, #tpu.memory_space<vmem>>, vector<8x128xf32>,
    return
  }
  func.func @transform_0(%arg0: i32) -> (i32, i32) {
    %c0_i32 = arith.constant 0 : i32
    %c0_i32_0 = arith.constant 0 : i32
    return %arg0, %c0_i32 : i32, i32
  }
  func.func @transform_1(%arg0: i32) -> (i32, i32) {
    %c0_i32 = arith.constant 0 : i32
    %c0_i32_0 = arith.constant 0 : i32
    %c0_i32_1 = arith.constant 0 : i32
    return %c0_i32, %c0_i32_0 : i32, i32
  }
  func.func @transform_2(%arg0: i32) -> (i32, i32) {
    %c0_i32 = arith.constant 0 : i32
    %c0_i32_0 = arith.constant 0 : i32
    %c0_i32_1 = arith.constant 0 : i32
    return %c0_i32, %c0_i32_0 : i32, i32
  }
  func.func @transform_3(%arg0: i32) -> (i32, i32) {
    %c0_i32 = arith.constant 0 : i32
    %c0_i32_0 = arith.constant 0 : i32
    %c0_i32_1 = arith.constant 0 : i32
    return %c0_i32, %c0_i32_0 : i32, i32
  }
  func.func @transform_4(%arg0: i32) -> (i32, i32) {
    %c0_i32 = arith.constant 0 : i32
    %c0_i32_0 = arith.constant 0 : i32
    %c0_i32_1 = arith.constant 0 : i32
    return %c0_i32, %c0_i32_0 : i32, i32
  }
  func.func @transform_5(%arg0: i32) -> (i32, i32) {
    %c0_i32 = arith.constant 0 : i32
    %c0_i32_0 = arith.constant 0 : i32
    %c0_i32_1 = arith.constant 0 : i32
    return %c0_i32, %c0_i32_0 : i32, i32
  }
  func.func @transform_6(%arg0: i32) -> (i32, i32) {
    %c0_i32 = arith.constant 0 : i32
    %c0_i32_0 = arith.constant 0 : i32
    %c0_i32_1 = arith.constant 0 : i32
    return %c0_i32, %c0_i32_0 : i32, i32
  }
  func.func @transform_7(%arg0: i32) -> (i32, i32) {
    %c0_i32 = arith.constant 0 : i32
    %c0_i32_0 = arith.constant 0 : i32
    %c0_i32_1 = arith.constant 0 : i32
    return %c0_i32, %c0_i32_0 : i32, i32
  }
  func.func @transform_8(%arg0: i32) -> (i32, i32) {
    %c0_i32 = arith.constant 0 : i32
    %c0_i32_0 = arith.constant 0 : i32
    %c0_i32_1 = arith.constant 0 : i32
    return %c0_i32, %c0_i32_0 : i32, i32
  }
  func.func @transform_9(%arg0: i32) -> (i32, i32) {
    %c0_i32 = arith.constant 0 : i32
    %c0_i32_0 = arith.constant 0 : i32
    %c0_i32_1 = arith.constant 0 : i32
    return %c0_i32, %c0_i32_0 : i32, i32
  }
  func.func @transform_10(%arg0: i32) -> (i32, i32) {
    %c0_i32 = arith.constant 0 : i32
    %c0_i32_0 = arith.constant 0 : i32
    %c0_i32_1 = arith.constant 0 : i32
    return %c0_i32, %c0_i32_0 : i32, i32
  }
  func.func @transform_11(%arg0: i32) -> (i32, i32) {
    %c0_i32 = arith.constant 0 : i32
    %c0_i32_0 = arith.constant 0 : i32
    return %arg0, %c0_i32 : i32, i32
  }
}

</mosaic_0001>

<bundles_post_ra>
// kernel: tpu_custom_call.1
= control target key start
LH: loop header
LB: loop body
LE: loop exit
PB: predicated region body
PF: predicated region fallthrough
CT: control target
= control target key end

     0   :  { %16 = vsyncpa [#allocation3], 0  ;;  %s1507_s0 = inlined_call_operand.hbm [shape: f32[8,192], index: 0, kind: input, shape index: {}]   ;;  %s1508_s1 = inlined_call_operand.hbm [shape: bf16[192,256], index: 1, kind: input, shape index: {}]   ;;  %s1509_s2 = inlined_call_operand.vmem [shape: f32[1,256], index: 2, kind: input, shape index: {}]   ;;  %s1510_s3 = inlined_call_operand.hbm [shape: bf16[256,128], index: 3, kind: input, shape index: {}]   ;;  %s1511_s4 = inlined_call_operand.vmem [shape: f32[1,128], index: 4, kind: input, shape index: {}]   ;;  %s1512_s5 = inlined_call_operand.hbm [shape: bf16[128,128], index: 5, kind: input, shape index: {}]   ;;  %s1513_s6 = inlined_call_operand.vmem [shape: f32[1,128], index: 6, kind: input, shape index: {}]   ;;  %s1514_s7 = inlined_call_operand.hbm [shape: bf16[128,128], index: 7, kind: input, shape index: {}]   ;;  %s1515_s8 = inlined_call_operand.vmem [shape: f32[1,128], index: 8, kind: input, shape index: {}]   ;;  %s1516_s9 = inlined_call_operand.hbm [shape: bf16[128,128], index: 9, kind: input, shape index: {}]   ;;  %s1517_s10 = inlined_call_operand.vmem [shape: f32[1,128], index: 10, kind: input, shape index: {}]   ;;  %s1518_s11 = inlined_call_operand.hbm [shape: f32[8,128], index: 11, kind: output, shape index: {}]  }
   0x1   :  { %17 = vsyncpa [#allocation6], 0 }
   0x2   :  { %18 = vsyncpa [#allocation9], 0 }
   0x3   :  { %19 = vsyncpa [#allocation12], 0 }
   0x4   :  { %20 = vsyncpa [#allocation4], 0  ;;  %s1293_s17 = smov [#allocation5]   ;;  %s1129_s21 = scalar_lea.hbm %s1508_s1, 3072 }
   0x5   :  { %s36_s18 = sshll.u32 %s1293_s17, 4  ;;  %p1130_p0 = scmp.ne.s32.totalorder %s1508_s1, %s1129_s21  ;;  %s37_s18 = int_to_ptr.vmem [resolvable:$true] %s36_s18 }
   0x6   :  { %p1133_p1 = scmp.lt.u32.totalorder %s1129_s21, %s1508_s1 }
   0x8   :  { %p1135_p2 = pnand %p1133_p1, %p1130_p0 }
   0xa   :  { %1138 = shalt.err (!%p1135_p2)
}
   0xb   :  { %s1139_s26 = scalar_lea.vmem %s37_s18, 3072  ;;  %p1144_p4 = scmp.lt.s32.totalorder %s37_s18, %s37_s18 }
   0xc   :  { %p1140_p3 = scmp.ne.s32.totalorder %s37_s18, %s1139_s26  ;;  %p1145_p5 = scmp.lt.s32.totalorder %s1139_s26, %s1139_s26 }
   0xe   :  { %p1146_p6 = por %p1145_p5, %p1144_p4 }
  0x10   :  { %p1147_p7 = pnand %p1146_p6, %p1140_p3 }
  0x12   :  { %1150 = shalt.err (!%p1147_p7)
}
  0x13   :  { %s1294_s27 = smov 128   ;;  %s1295_s28 = smov 8  }
  0x14   :  { %42 = dma.hbm_to_vmem [thread:$0]  %s1508_s1, 3072, %s37_s18, [#allocation6], %s1294_s27, %s1294_s27, %s1295_s28  }
  0x15   :  { %s1296_s12 = smov [#allocation8]   ;;  %s1297_s14 = smov [#allocation2]  }
  0x16   :  { %s64_s13 = sshll.u32 %s1296_s12, 4  ;;  %s27_s15 = sshll.u32 %s1297_s14, 4  ;;  %s65_s13 = int_to_ptr.vmem [resolvable:$true] %s64_s13  ;;  %s28_s15 = int_to_ptr.vmem [resolvable:$true] %s27_s15 }
  0x17   :  { %s1151_s19 = scalar_lea.hbm %s1512_s5, 1024 }
  0x18   :  { %p1152_p8 = scmp.ne.s32.totalorder %s1512_s5, %s1151_s19  ;;  %p1155_p9 = scmp.lt.u32.totalorder %s1151_s19, %s1512_s5 }
  0x1a   :  { %p1157_p10 = pnand %p1155_p9, %p1152_p8 }
  0x1c   :  { %1160 = shalt.err (!%p1157_p10)
}
  0x1d   :  { %s1161_s1 = scalar_lea.vmem %s65_s13, 1024  ;;  %p1166_p12 = scmp.lt.s32.totalorder %s65_s13, %s65_s13 }
  0x1e   :  { %p1162_p11 = scmp.ne.s32.totalorder %s65_s13, %s1161_s1  ;;  %p1167_p13 = scmp.lt.s32.totalorder %s1161_s1, %s1161_s1 }
  0x20   :  { %p1168_p0 = por %p1167_p13, %p1166_p12 }
  0x22   :  { %p1169_p1 = pnand %p1168_p0, %p1162_p11 }
  0x24   :  { %1172 = shalt.err (!%p1169_p1)
}
  0x25   :  { %s1298_s18 = smov 64   ;;  %s1299_s24 = smov 4  }
  0x26   :  { %70 = dma.hbm_to_vmem [thread:$0]  %s1512_s5, 1024, %s65_s13, [#allocation9], %s1298_s18, %s1298_s18, %s1299_s24  }
  0x27   :  { %s1173_s29 = scalar_lea.hbm %s1507_s0, 256 }
  0x28   :  { %p1174_p2 = scmp.ne.s32.totalorder %s1507_s0, %s1173_s29  ;;  %p1177_p3 = scmp.lt.u32.totalorder %s1173_s29, %s1507_s0 }
  0x2a   :  { %p1179_p4 = pnand %p1177_p3, %p1174_p2 }
  0x2c   :  { %1182 = shalt.err (!%p1179_p4)
}
  0x2d   :  { %s1183_s17 = scalar_lea.vmem %s28_s15, 256  ;;  %p1188_p6 = scmp.lt.s32.totalorder %s28_s15, %s28_s15 }
  0x2e   :  { %p1184_p5 = scmp.ne.s32.totalorder %s28_s15, %s1183_s17  ;;  %p1189_p7 = scmp.lt.s32.totalorder %s1183_s17, %s1183_s17 }
  0x30   :  { %p1190_p8 = por %p1189_p7, %p1188_p6 }
  0x32   :  { %p1191_p9 = pnand %p1190_p8, %p1184_p5 }
  0x34   :  { %1194 = shalt.err (!%p1191_p9)
}
  0x35   :  { %30 = dma.hbm_to_vmem [thread:$0]  %s1507_s0, 256, %s28_s15, [#allocation3]  }
  0x36   :  { %s1300_s19 = smov [#allocation7]   ;;  %s1301_s21 = smov [#allocation10]  }
  0x37   :  { %s50_s20 = sshll.u32 %s1300_s19, 4  ;;  %s78_s22 = sshll.u32 %s1301_s21, 4  ;;  %s51_s20 = int_to_ptr.vmem [resolvable:$true] %s50_s20  ;;  %s79_s22 = int_to_ptr.vmem [resolvable:$true] %s78_s22 }
  0x38   :  { %s1195_s25 = scalar_lea.hbm %s1510_s3, 2048 }
  0x39   :  { %p1196_p10 = scmp.ne.s32.totalorder %s1510_s3, %s1195_s25  ;;  %p1199_p11 = scmp.lt.u32.totalorder %s1195_s25, %s1510_s3 }
  0x3b   :  { %p1201_p12 = pnand %p1199_p11, %p1196_p10 }
  0x3d   :  { %1204 = shalt.err (!%p1201_p12)
}
  0x3e   :  { %s1205_s0 = scalar_lea.vmem %s51_s20, 2048  ;;  %p1210_p0 = scmp.lt.s32.totalorder %s51_s20, %s51_s20 }
  0x3f   :  { %p1206_p13 = scmp.ne.s32.totalorder %s51_s20, %s1205_s0  ;;  %p1211_p1 = scmp.lt.s32.totalorder %s1205_s0, %s1205_s0 }
  0x41   :  { %p1212_p2 = por %p1211_p1, %p1210_p0 }
  0x43   :  { %p1213_p3 = pnand %p1212_p2, %p1206_p13 }
  0x45   :  { %1216 = shalt.err (!%p1213_p3)
}
  0x46   :  { %56 = dma.hbm_to_vmem [thread:$0]  %s1510_s3, 2048, %s51_s20, [#allocation6], %s1298_s18, %s1298_s18, %s1299_s24  }
  0x47   :  { %s1217_s16 = scalar_lea.hbm %s1514_s7, 1024 }
  0x48   :  { %p1218_p4 = scmp.ne.s32.totalorder %s1514_s7, %s1217_s16  ;;  %p1221_p5 = scmp.lt.u32.totalorder %s1217_s16, %s1514_s7 }
  0x4a   :  { %p1223_p6 = pnand %p1221_p5, %p1218_p4 }
  0x4c   :  { %1226 = shalt.err (!%p1223_p6)
}
  0x4d   :  { %s1227_s21 = scalar_lea.vmem %s79_s22, 1024  ;;  %p1232_p8 = scmp.lt.s32.totalorder %s79_s22, %s79_s22 }
  0x4e   :  { %p1228_p7 = scmp.ne.s32.totalorder %s79_s22, %s1227_s21  ;;  %p1233_p9 = scmp.lt.s32.totalorder %s1227_s21, %s1227_s21 }
  0x50   :  { %p1234_p10 = por %p1233_p9, %p1232_p8 }
  0x52   :  { %p1235_p11 = pnand %p1234_p10, %p1228_p7 }
  0x54   :  { %1238 = shalt.err (!%p1235_p11)
}
  0x55   :  { %84 = dma.hbm_to_vmem [thread:$0]  %s1514_s7, 1024, %s79_s22, [#allocation9], %s1298_s18, %s1298_s18, %s1299_s24  }
  0x56   :  { %s1302_s23 = smov [#allocation11]   ;;  %s1239_s27 = scalar_lea.hbm %s1516_s9, 1024 }
  0x57   :  { %s92_s1 = sshll.u32 %s1302_s23, 4  ;;  %p1240_p12 = scmp.ne.s32.totalorder %s1516_s9, %s1239_s27  ;;  %s93_s1 = int_to_ptr.vmem [resolvable:$true] %s92_s1 }
  0x58   :  { %p1243_p13 = scmp.lt.u32.totalorder %s1239_s27, %s1516_s9 }
  0x5a   :  { %p1245_p0 = pnand %p1243_p13, %p1240_p12 }
  0x5c   :  { %1248 = shalt.err (!%p1245_p0)
}
  0x5d   :  { %s1249_s30 = scalar_lea.vmem %s93_s1, 1024  ;;  %p1254_p2 = scmp.lt.s32.totalorder %s93_s1, %s93_s1 }
  0x5e   :  { %p1250_p1 = scmp.ne.s32.totalorder %s93_s1, %s1249_s30  ;;  %p1255_p3 = scmp.lt.s32.totalorder %s1249_s30, %s1249_s30 }
  0x60   :  { %p1256_p4 = por %p1255_p3, %p1254_p2 }
  0x62   :  { %p1257_p5 = pnand %p1256_p4, %p1250_p1 }
  0x64   :  { %1260 = shalt.err (!%p1257_p5)
}
  0x65   :  { %98 = dma.hbm_to_vmem [thread:$0]  %s1516_s9, 1024, %s93_s1, [#allocation12], %s1298_s18, %s1298_s18, %s1299_s24  }
  0x66   :  { %1283 = dma.done.wait [#allocation3], 256  }
  0x67   :  { %1284 = vsyncadd [#allocation3], 4294967040 }
  0x68   :  { %1285 = dma.done.wait [#allocation6], 5120  }
  0x69   :  { %1286 = vsyncadd [#allocation6], 4294962176 }
  0x6a   :  { %1287 = dma.done.wait [#allocation9], 2048  }
  0x6b   :  { %1288 = vsyncadd [#allocation9], 4294965248 }
  0x6c   :  { %1289 = dma.done.wait [#allocation12], 1024  }
  0x6d   :  { %1290 = vsyncadd [#allocation12], 4294966272  ;;  %v1053_v0 = vld [vmem:[#allocation5 + $0x4] ss:$8 sps:$4 sm:$0xff]   ;;  %v1055_v1 = vld [vmem:[#allocation5] ss:$8 sps:$4 sm:$0xff]   ;;  %v150_v45 = vlaneseq }
  0x6e   :  { %284 = vmatprep.subr.bf16.mxu0 %v1053_v0  ;;  %v1056_v2 = vld [vmem:[#allocation5 + $0x14] ss:$8 sps:$4 sm:$0xff]   ;;  %v1058_v3 = vld [vmem:[#allocation5 + $0x10] ss:$8 sps:$4 sm:$0xff]   ;;  %v1059_v4 = vld [vmem:[#allocation5 + $0x24] ss:$8 sps:$4 sm:$0xff]  }
  0x6f   :  { %285 = vmatpush1.bf16.msra.mxu0 %v1055_v1  ;;  %v1061_v5 = vld [vmem:[#allocation5 + $0x20] ss:$8 sps:$4 sm:$0xff]   ;;  %v1062_v6 = vld [vmem:[#allocation5 + $0x34] ss:$8 sps:$4 sm:$0xff]   ;;  %v1064_v7 = vld [vmem:[#allocation5 + $0x30] ss:$8 sps:$4 sm:$0xff]  }
  0x70   :  { %286 = vmatprep.subr.bf16.mxu0 %v1056_v2  ;;  %v1065_v8 = vld [vmem:[#allocation5 + $0x44] ss:$8 sps:$4 sm:$0xff]   ;;  %v1067_v9 = vld [vmem:[#allocation5 + $0x40] ss:$8 sps:$4 sm:$0xff]   ;;  %v1068_v10 = vld [vmem:[#allocation5 + $0x54] ss:$8 sps:$4 sm:$0xff]  }
  0x71   :  { %v121_v11 = vld [vmem:[#allocation2 + $0x8] sm:$0xff]  ;;  %vm280_vm0 = vcmask 523264   ;;  %v1089_v14 = vld [vmem:[#allocation7 + $0x40] sm:$0xff]   ;;  %v1091_v16 = vld [vmem:[#allocation7 + $0x48] sm:$0xff]   ;;  %v1303_v44 = vmov 0.0   ;;  %v151_v46 = vshrl.u32 %v150_v45, 7 }
  0x72   :  { %v1070_v12 = vld [vmem:[#allocation5 + $0x50] ss:$8 sps:$4 sm:$0xff]   ;;  %v123_v13 = vpack.c.bf16 %v121_v11, %v121_v11  ;;  %v1090_v15 = vld [vmem:[#allocation7] sm:$0xff]   ;;  %931 = vmatprep.subr.bf16.mxu1 %v1089_v14  ;;  %v1092_v18 = vld [vmem:[#allocation7 + $0x8] sm:$0xff]   ;;  %vm1304_vm1 = vmmov 0   ;;  %s1305_s5 = smov [#allocation13]  }
  0x73   :  { %287 = vmatpush1.bf16.msra.mxu0 %v1058_v3  ;;  %v1071_v17 = vld [vmem:[#allocation5 + $0x64] ss:$8 sps:$4 sm:$0xff]   ;;  %932 = vmatpush3.bf16.msra.mxu1 %v1090_v15  ;;  %v1093_v19 = vld [vmem:[#allocation7 + $0x50] sm:$0xff]   ;;  %v1073_v20 = vld [vmem:[#allocation5 + $0x60] ss:$8 sps:$4 sm:$0xff]   ;;  %v152_v47 = vsub.s32 0, %v151_v46 }
  0x74   :  { %288 = vmatprep.subr.bf16.mxu0 %v1059_v4  ;;  %886 = vmatprep.mubr.msk.bf16.mxu0 %vm280_vm0, %v123_v13  ;;  %v1074_v21 = vld [vmem:[#allocation5 + $0x74] ss:$8 sps:$4 sm:$0xff]   ;;  %v1076_v22 = vld [vmem:[#allocation5 + $0x70] ss:$8 sps:$4 sm:$0xff]   ;;  %v1077_v25 = vld [vmem:[#allocation5 + $0x84] ss:$8 sps:$4 sm:$0xff]  }
  0x75   :  { %933 = vmatprep.subr.bf16.mxu1 %v1091_v16  ;;  %v1094_v23 = vld [vmem:[#allocation7 + $0x10] sm:$0xff]   ;;  %v1095_v24 = vld [vmem:[#allocation7 + $0x58] sm:$0xff]   ;;  %v1097_v27 = vld [vmem:[#allocation7 + $0x60] sm:$0xff]   ;;  %v156_v49 = vsub.s32 1, %v151_v46  ;;  %s850_s13 = sshll.u32 %s1305_s5, 4  ;;  %s851_s13 = int_to_ptr.vmem [resolvable:$true] %s850_s13 }
  0x76   :  { %v1096_v26 = vld [vmem:[#allocation7 + $0x18] sm:$0xff]   ;;  %v1079_v28 = vld [vmem:[#allocation5 + $0x80] ss:$8 sps:$4 sm:$0xff]   ;;  %v1083_v33 = vld [vmem:[#allocation5 + $0xa4] ss:$8 sps:$4 sm:$0xff]   ;;  %p1266_p7 = scmp.lt.s32.totalorder %s851_s13, %s851_s13 }
  0x77   :  { %289 = vmatpush1.bf16.msra.mxu0 %v1061_v5  ;;  %934 = vmatpush3.bf16.msra.mxu1 %v1092_v18  ;;  %v1080_v29 = vld [vmem:[#allocation5 + $0x94] ss:$8 sps:$4 sm:$0xff]   ;;  %v1098_v30 = vld [vmem:[#allocation7 + $0x20] sm:$0xff]   ;;  %v1099_v31 = vld [vmem:[#allocation7 + $0x68] sm:$0xff]  }
  0x78   :  { %290 = vmatprep.subr.bf16.mxu0 %v1062_v6  ;;  %935 = vmatprep.subr.bf16.mxu1 %v1093_v19  ;;  %v1082_v32 = vld [vmem:[#allocation5 + $0x90] ss:$8 sps:$4 sm:$0xff]   ;;  %v1100_v34 = vld [vmem:[#allocation7 + $0x28] sm:$0xff]   ;;  %v1086_v36 = vld [vmem:[#allocation5 + $0xb4] ss:$8 sps:$4 sm:$0xff]  }
  0x79   :  { %v1085_v35 = vld [vmem:[#allocation5 + $0xa0] ss:$8 sps:$4 sm:$0xff]   ;;  %v1088_v37 = vld [vmem:[#allocation5 + $0xb0] ss:$8 sps:$4 sm:$0xff]  }
  0x7a   :  { %v120_v38 = vld [vmem:[#allocation2] sm:$0xff]  ;;  %v1103_v42 = vld [vmem:[#allocation7 + $0x78] sm:$0xff]   ;;  %v1105_v61 = vld [vmem:[#allocation8] sm:$0xff]  }
  0x7b   :  { %291 = vmatpush1.bf16.msra.mxu0 %v1064_v7  ;;  %936 = vmatpush3.bf16.msra.mxu1 %v1094_v23  ;;  %v122_v39 = vpack.c.bf16 %v120_v38, %v120_v38  ;;  %v1101_v40 = vld [vmem:[#allocation7 + $0x70] sm:$0xff]   ;;  %v1104_v43 = vld [vmem:[#allocation7 + $0x38] sm:$0xff]   ;;  %v1106_v63 = vld [vmem:[#allocation8 + $0x8] sm:$0xff]  }
  0x7c   :  { %292 = vmatprep.subr.bf16.mxu0 %v1065_v8  ;;  %937 = vmatprep.subr.bf16.mxu1 %v1095_v24  ;;  %v1102_v41 = vld [vmem:[#allocation7 + $0x30] sm:$0xff]   ;;  %v1108_v1 = vld [vmem:[#allocation8 + $0x18] sm:$0xff]   ;;  %v1109_v2 = vld [vmem:[#allocation8 + $0x20] sm:$0xff]  }
  0x7d   :  { %v148_v48 = vld [vmem:[%s1509_s2] sm:$0x3]  ;;  %v1110_v3 = vld [vmem:[#allocation8 + $0x28] sm:$0xff]   ;;  %v1112_v5 = vld [vmem:[#allocation8 + $0x38] sm:$0xff]  }
  0x7e   :  { %v153_v50 = vrot.slane %v148_v48, %v152_v47  ;;  %v157_v51 = vrot.slane %v148_v48, %v156_v49  ;;  %v1107_v0 = vld [vmem:[#allocation8 + $0x10] sm:$0xff]   ;;  %v1113_v6 = vld [vmem:[#allocation10] sm:$0xff]   ;;  %v1114_v7 = vld [vmem:[#allocation10 + $0x8] sm:$0xff]  }
  0x7f   :  { %293 = vmatpush1.bf16.msra.mxu0 %v1067_v9  ;;  %938 = vmatpush3.bf16.msra.mxu1 %v1096_v26  ;;  %v1111_v4 = vld [vmem:[#allocation8 + $0x30] sm:$0xff]   ;;  %v1116_v9 = vld [vmem:[#allocation10 + $0x18] sm:$0xff]   ;;  %v1118_v11 = vld [vmem:[#allocation10 + $0x28] sm:$0xff]  }
  0x80   :  { %294 = vmatprep.subr.bf16.mxu0 %v1068_v10  ;;  %939 = vmatprep.subr.bf16.mxu1 %v1097_v27  ;;  %v1115_v8 = vld [vmem:[#allocation10 + $0x10] sm:$0xff]   ;;  %v1117_v10 = vld [vmem:[#allocation10 + $0x20] sm:$0xff]   ;;  %v1122_v24 = vld [vmem:[#allocation11 + $0x8] sm:$0xff]  }
  0x81   :  { %v887_v13 = vld [vmem:[%s1511_s4] ss:$0 sm:$0xff]  ;;  %v1121_v23 = vld [vmem:[#allocation11] sm:$0xff]   ;;  %v1124_v26 = vld [vmem:[#allocation11 + $0x18] sm:$0xff]  }
  0x82   :  { %v1125_v27 = vld [vmem:[#allocation11 + $0x20] sm:$0xff]   ;;  %v1128_v38 = vld [vmem:[#allocation11 + $0x38] sm:$0xff]   ;;  %v922_v48 = vld [vmem:[%s1517_s10] ss:$0 sm:$0xff] }
  0x83   :  { %295 = vmatpush1.bf16.msra.mxu0 %v1070_v12  ;;  %940 = vmatpush3.bf16.msra.mxu1 %v1098_v30 }
  0x84   :  { %296 = vmatprep.subr.bf16.mxu0 %v1071_v17  ;;  %941 = vmatprep.subr.bf16.mxu1 %v1099_v31 }
  0x87   :  { %297 = vmatpush1.bf16.msra.mxu0 %v1073_v20  ;;  %942 = vmatpush3.bf16.msra.mxu1 %v1100_v34 }
  0x88   :  { %298 = vmatprep.subr.bf16.mxu0 %v1074_v21  ;;  %943 = vmatprep.subr.bf16.mxu1 %v1101_v40  ;;  %v1119_v21 = vld [vmem:[#allocation10 + $0x30] sm:$0xff]  }
  0x8b   :  { %299 = vmatpush1.bf16.msra.mxu0 %v1076_v22  ;;  %944 = vmatpush3.bf16.msra.mxu1 %v1102_v41  ;;  %v1120_v22 = vld [vmem:[#allocation10 + $0x38] sm:$0xff]  }
  0x8c   :  { %300 = vmatprep.subr.bf16.mxu0 %v1077_v25  ;;  %945 = vmatprep.subr.bf16.mxu1 %v1103_v42  ;;  %v1123_v25 = vld [vmem:[#allocation11 + $0x10] sm:$0xff]  }
  0x8f   :  { %301 = vmatpush1.bf16.msra.mxu0 %v1079_v28  ;;  %946 = vmatpush3.bf16.msra.mxu1 %v1104_v43  ;;  %v1126_v28 = vld [vmem:[#allocation11 + $0x28] sm:$0xff]  }
  0x90   :  { %302 = vmatprep.subr.bf16.mxu0 %v1080_v29  ;;  %980 = vmatprep.subr.bf16.mxu1 %v1303_v44  ;;  %v904_v29 = vld [vmem:[%s1513_s6] ss:$0 sm:$0xff] }
  0x93   :  { %303 = vmatpush1.bf16.msra.mxu0 %v1082_v32 }
  0x94   :  { %304 = vmatprep.subr.bf16.mxu0 %v1083_v33 }
  0x97   :  { %305 = vmatpush1.bf16.msra.mxu0 %v1085_v35 }
  0x98   :  { %306 = vmatprep.subr.bf16.mxu0 %v1086_v36 }
  0x9b   :  { %307 = vmatpush1.bf16.msra.mxu0 %v1088_v37  ;;  %v1127_v37 = vld [vmem:[#allocation11 + $0x30] sm:$0xff]  }
  0x9c   :  { %1000 = vmatprep.subr.bf16.mxu0 %v1303_v44 }
  0x9e   :  { %317 = vmatmul.mubr.bf16.vlgmr.msra.gmra.mrb[0].mxu0 %v122_v39  ;;  %v913_v39 = vld [vmem:[%s1515_s8] ss:$0 sm:$0xff]  ;;  %s1261_s8 = scalar_lea.vmem %s851_s13, 128 }
  0x9f   :  { %1016 = vmatprep.mubr.msk.bf16.mxu0 %vm1304_vm1, %v1303_v44  ;;  %1001 = vmatpush3.bf16.msra.mxu0 %v1113_v6  ;;  %p1262_p6 = scmp.ne.s32.totalorder %s851_s13, %s1261_s8  ;;  %p1267_p8 = scmp.lt.s32.totalorder %s1261_s8, %s1261_s8 }
  0xa0   :  { %1002 = vmatprep.subr.bf16.mxu0 %v1303_v44 }
  0xa1   :  { %p1268_p9 = por %p1267_p8, %p1266_p7 }
  0xa3   :  { %1003 = vmatpush3.bf16.msra.mxu0 %v1114_v7  ;;  %p1269_p10 = pnand %p1268_p9, %p1262_p6 }
  0xa4   :  { %1004 = vmatprep.subr.bf16.mxu0 %v1303_v44 }
  0xa7   :  { %1005 = vmatpush3.bf16.msra.mxu0 %v1115_v8 }
  0xa8   :  { %1006 = vmatprep.subr.bf16.mxu0 %v1303_v44 }
  0xab   :  { %1007 = vmatpush3.bf16.msra.mxu0 %v1116_v9 }
  0xac   :  { %1008 = vmatprep.subr.bf16.mxu0 %v1303_v44 }
  0xaf   :  { %1009 = vmatpush3.bf16.msra.mxu0 %v1117_v10 }
  0xb0   :  { %1010 = vmatprep.subr.bf16.mxu0 %v1303_v44 }
  0xb3   :  { %1011 = vmatpush3.bf16.msra.mxu0 %v1118_v11 }
  0xb4   :  { %1012 = vmatprep.subr.bf16.mxu0 %v1303_v44 }
  0xb7   :  { %1013 = vmatpush3.bf16.msra.mxu0 %v1119_v21 }
  0xb8   :  { %1014 = vmatprep.subr.bf16.mxu0 %v1303_v44 }
  0xbb   :  { %1015 = vmatpush3.bf16.msra.mxu0 %v1120_v22 }
 0x171   :  { %v318_v52 = vpop.f32.mrb[0].mxu0 }
 0x172   :  { %v319_v53 = vadd.f32 %v318_v52, %v153_v50  ;;  %v320_v54 = vpop.f32.mrb[1].mxu0 }
 0x173   :  { %v321_v55 = vadd.f32 %v320_v54, %v157_v51  ;;  %v322_v56 = vpop.f32.mrb[2].mxu0 }
 0x174   :  { %v325_v57 = vmax.f32 %v319_v53, 0.0  ;;  %v323_v58 = vpop.f32.mrb[3].mxu0 }
 0x175   :  { %v326_v59 = vmax.f32 %v321_v55, 0.0 }
 0x176   :  { %v327_v62 = vpack.c.bf16 %v325_v57, %v325_v57 }
 0x177   :  { %v328_v60 = vpack.c.bf16 %v326_v59, %v326_v59 }
 0x179   :  { %496 = vmatprep.mubr.bf16.mxu1 %v328_v60 }
 0x17a   :  { %497 = vmatmul.mubr.bf16.vlgmr.msra.gmra.mrb[0].mxu1 %v327_v62 }
 0x17b   :  { %981 = vmatpush3.bf16.msra.mxu1 %v1105_v61  ;;  %996 = vmatprep.mubr.msk.bf16.mxu1 %vm1304_vm1, %v1303_v44 }
 0x17c   :  { %982 = vmatprep.subr.bf16.mxu1 %v1303_v44 }
 0x17f   :  { %983 = vmatpush3.bf16.msra.mxu1 %v1106_v63 }
 0x180   :  { %984 = vmatprep.subr.bf16.mxu1 %v1303_v44 }
 0x183   :  { %985 = vmatpush3.bf16.msra.mxu1 %v1107_v0 }
 0x184   :  { %986 = vmatprep.subr.bf16.mxu1 %v1303_v44 }
 0x187   :  { %987 = vmatpush3.bf16.msra.mxu1 %v1108_v1 }
 0x188   :  { %988 = vmatprep.subr.bf16.mxu1 %v1303_v44 }
 0x18b   :  { %989 = vmatpush3.bf16.msra.mxu1 %v1109_v2 }
 0x18c   :  { %990 = vmatprep.subr.bf16.mxu1 %v1303_v44 }
 0x18f   :  { %991 = vmatpush3.bf16.msra.mxu1 %v1110_v3 }
 0x190   :  { %992 = vmatprep.subr.bf16.mxu1 %v1303_v44 }
 0x193   :  { %993 = vmatpush3.bf16.msra.mxu1 %v1111_v4 }
 0x194   :  { %994 = vmatprep.subr.bf16.mxu1 %v1303_v44 }
 0x197   :  { %995 = vmatpush3.bf16.msra.mxu1 %v1112_v5 }
 0x198   :  { %1020 = vmatprep.subr.bf16.mxu1 %v1303_v44 }
 0x24d   :  { %v947_v12 = vpop.f32.mrb[0].mxu1 }
 0x24e   :  { %v948_v14 = vpop.f32.mrb[1].mxu1 }
 0x24f   :  { %v949_v15 = vadd.f32 %v948_v14, %v947_v12  ;;  %v950_v16 = vpop.f32.mrb[2].mxu1 }
 0x250   :  { %v951_v17 = vpop.f32.mrb[3].mxu1 }
 0x251   :  { %v499_v18 = vadd.f32 %v949_v15, %v887_v13 }
 0x253   :  { %v504_v19 = vmax.f32 %v499_v18, 0.0 }
 0x255   :  { %v505_v20 = vpack.c.bf16 %v504_v19, %v504_v19 }
 0x257   :  { %997 = vmatmul.mubr.bf16.vlgmr.msra.gmra.mrb[4].mxu1 %v505_v20 }
 0x258   :  { %1036 = vmatprep.mubr.msk.bf16.mxu1 %vm1304_vm1, %v1303_v44  ;;  %1021 = vmatpush3.bf16.msra.mxu1 %v1121_v23 }
 0x259   :  { %1022 = vmatprep.subr.bf16.mxu1 %v1303_v44 }
 0x25c   :  { %1023 = vmatpush3.bf16.msra.mxu1 %v1122_v24 }
 0x25d   :  { %1024 = vmatprep.subr.bf16.mxu1 %v1303_v44 }
 0x260   :  { %1025 = vmatpush3.bf16.msra.mxu1 %v1123_v25 }
 0x261   :  { %1026 = vmatprep.subr.bf16.mxu1 %v1303_v44 }
 0x264   :  { %1027 = vmatpush3.bf16.msra.mxu1 %v1124_v26 }
 0x265   :  { %1028 = vmatprep.subr.bf16.mxu1 %v1303_v44 }
 0x268   :  { %1029 = vmatpush3.bf16.msra.mxu1 %v1125_v27 }
 0x269   :  { %1030 = vmatprep.subr.bf16.mxu1 %v1303_v44 }
 0x26c   :  { %1031 = vmatpush3.bf16.msra.mxu1 %v1126_v28 }
 0x26d   :  { %1032 = vmatprep.subr.bf16.mxu1 %v1303_v44 }
 0x270   :  { %1033 = vmatpush3.bf16.msra.mxu1 %v1127_v37 }
 0x271   :  { %1034 = vmatprep.subr.bf16.mxu1 %v1303_v44 }
 0x274   :  { %1035 = vmatpush3.bf16.msra.mxu1 %v1128_v38 }
 0x32a   :  { %v611_v30 = vpop.f32.mrb[4].mxu1 }
 0x32b   :  { %v612_v31 = vadd.f32 %v904_v29, %v611_v30  ;;  %v998_v32 = vpop.f32.mrb[5].mxu1 }
 0x32c   :  { %v614_v33 = vpop.f32.mrb[6].mxu1 }
 0x32d   :  { %v617_v34 = vmax.f32 %v612_v31, 0.0  ;;  %v999_v35 = vpop.f32.mrb[7].mxu1 }
 0x32f   :  { %v618_v36 = vpack.c.bf16 %v617_v34, %v617_v34 }
 0x331   :  { %1017 = vmatmul.mubr.bf16.vlgmr.msra.gmra.mrb[4].mxu0 %v618_v36 }
 0x404   :  { %v724_v40 = vpop.f32.mrb[4].mxu0 }
 0x405   :  { %v725_v41 = vadd.f32 %v913_v39, %v724_v40  ;;  %v1018_v42 = vpop.f32.mrb[5].mxu0 }
 0x406   :  { %v727_v43 = vpop.f32.mrb[6].mxu0 }
 0x407   :  { %v730_v45 = vmax.f32 %v725_v41, 0.0  ;;  %v1019_v46 = vpop.f32.mrb[7].mxu0 }
 0x409   :  { %v731_v47 = vpack.c.bf16 %v730_v45, %v730_v45 }
 0x40b   :  { %1037 = vmatmul.mubr.bf16.vlgmr.msra.gmra.mrb[8].mxu1 %v731_v47 }
 0x4de   :  { %v837_v44 = vpop.f32.mrb[8].mxu1 }
 0x4df   :  { %v838_v49 = vadd.f32 %v922_v48, %v837_v44  ;;  %v1038_v50 = vpop.f32.mrb[9].mxu1 }
 0x4e0   :  { %v840_v51 = vpop.f32.mrb[10].mxu1 }
 0x4e1   :  { %843 = vst [vmem:[#allocation13] sm:$0xff] %v838_v49  ;;  %v1039_v52 = vpop.f32.mrb[11].mxu1 }
 0x4e2   :  { %1272 = shalt.err (!%p1269_p10)
}
 0x4e3   :  { %s1273_s10 = scalar_lea.hbm %s1518_s11, 128 }
 0x4e4   :  { %p1274_p11 = scmp.ne.s32.totalorder %s1518_s11, %s1273_s10  ;;  %p1277_p12 = scmp.lt.u32.totalorder %s1273_s10, %s1518_s11 }
 0x4e6   :  { %p1279_p13 = pnand %p1277_p12, %p1274_p11 }
 0x4e8   :  { %1282 = shalt.err (!%p1279_p13)
}
 0x4e9   :  { %853 = dma.vmem_to_hbm [thread:$0]  %s851_s13, 128, %s1518_s11, [#allocation4]  }
 0x4ea   :  { %1291 = dma.done.wait [#allocation4], 128  }
 0x4eb   :  { %1292 = vsyncadd [#allocation4], 4294967168 }
 0x4ec   :  { %857 = vsyncpa [#allocation3], 1 }
 0x4ed   :  { %858 = vsyncpa [#allocation6], 1 }
 0x4ee   :  { %859 = vsyncpa [#allocation9], 1 }
 0x4ef   :  { %860 = vsyncpa [#allocation12], 1 }
 0x4f0   :  { %861 = vsyncpa [#allocation4], 1 }

</bundles_post_ra>
